<compile_context>
chip_gen: v7x
topology: tpu7x:2x2x1
jax: 0.10.0
libtpu: 0.0.40
codegen_flags: <defaults>
</compile_context>

<pallas_src>
import jax
import jax.numpy as jnp
from jax.experimental import pallas as pl
from jax.experimental.pallas import tpu as pltpu


_VPU_MAX_C = 8                           # <= this many input channels -> VPU FMA path
_MEGACORE_MIN_BYTES = 2 * 1024 * 1024    # only force >=2 grid blocks above this
_LANE_QUANT = 512                        # HW tile quantum when HW must be tiled


def _conv1x1_kernel(x_ref, w_ref, b_ref, o_ref):
    # x_ref: (t_n, C, t_hw)   w_ref: (O, C)   b_ref: (O, 1)   o_ref: (t_n, O, t_hw)
    C = x_ref.shape[1]
    b = b_ref[...].astype(jnp.float32)                      # (O, 1)

    if C <= _VPU_MAX_C:
        # Degenerate contraction: unrolled broadcast multiply-add on the VPU,
        # per-channel loads (no whole-tile materialization), f32 accumulation,
        # accumulator seeded from channel 0's product, bias folded in at the end.
        w = w_ref[...].astype(jnp.float32)                  # (O, C)
        acc = w[None, :, 0:1] * x_ref[:, 0:1, :].astype(jnp.float32)
        for c in range(1, C):
            acc = acc + w[None, :, c:c + 1] * x_ref[:, c:c + 1, :].astype(jnp.float32)
    else:
        # Real contraction: MXU matmul with f32 accumulation.
        acc = jnp.einsum("oc,nct->not", w_ref[...], x_ref[...],
                         preferred_element_type=jnp.float32)

    o_ref[...] = (acc + b[None, :, :]).astype(o_ref.dtype)


def _vmem_budget():
    """(block_budget_bytes, vmem_limit_bytes) derived from the actual chip."""
    try:
        vmem = int(pltpu.get_tpu_info().vmem_capacity_bytes)
    except Exception:
        vmem = 64 * 1024 * 1024          # conservative fallback (v7x-sized VMEM)
    budget = int(vmem * 0.35)            # double-buffered in+out block payload
    limit = int(vmem * 0.60)             # leave headroom for Mosaic scratch
    return budget, limit


def _pick_tiles(N, C, O, HW, dtype_bytes, budget):
    """Pick (t_n, t_hw).  Batch-first: keep t_hw == HW so every per-(n,c) row DMA is
    contiguous; only tile HW when a single batch alone exceeds the budget."""
    def blk_bytes(t_n, t_hw):
        return 2 * t_n * (C + O) * t_hw * dtype_bytes       # double-buffered in+out

    per_batch2 = blk_bytes(1, HW)
    if per_batch2 <= budget:
        t_n = max(1, min(N, budget // per_batch2))
        return t_n, HW

    # One batch alone is too big: tile HW with a large lane-dense tile.
    t_n = 1
    max_cols = budget // max(2 * (C + O) * dtype_bytes, 1)
    t_hw = (max_cols // _LANE_QUANT) * _LANE_QUANT
    if t_hw <= 0:                                            # pathological C+O
        t_hw = max(128, (max_cols // 128) * 128)
    t_hw = min(t_hw, HW)
    # Prefer a tile that divides HW exactly (avoids masked partial stores on a
    # ragged trailing block), searching down in 128-steps within 2x of the pick.
    if HW % t_hw != 0:
        cand = (t_hw // 128) * 128
        while cand >= max(128, t_hw // 2):
            if HW % cand == 0:
                t_hw = cand
                break
            cand -= 128
    return t_n, t_hw


def _ensure_megacore_split(N, HW, t_n, t_hw, total_bytes):
    """v7x has 2 TensorCores: make sure a big problem has >= 2 'parallel' blocks."""
    if total_bytes < _MEGACORE_MIN_BYTES:
        return t_n, t_hw
    if pl.cdiv(N, t_n) * pl.cdiv(HW, t_hw) >= 2:
        return t_n, t_hw
    if N >= 2:
        return pl.cdiv(N, 2), t_hw
    if HW >= 256:
        half = ((HW // 2) + 127) // 128 * 128
        return t_n, min(half, HW)
    return t_n, t_hw


def conv1x1_pallas(x_nchw, weight, bias):
    """kernel_size=1 Conv2d.  x_nchw: (N, C, H, W), weight: (O, C, 1, 1), bias: (O,)."""
    assert x_nchw.ndim == 4, f"expected NCHW input, got shape {x_nchw.shape}"
    N, C, H, W = x_nchw.shape
    O = weight.shape[0]
    assert weight.shape[1] == C, (weight.shape, x_nchw.shape)
    HW = H * W

    x_flat = x_nchw.reshape(N, C, HW)        # free row-major reshape
    w2d = weight.reshape(O, C)
    b2d = bias.reshape(O, 1)

    dtype_bytes = jnp.dtype(x_nchw.dtype).itemsize
    budget, vmem_limit = _vmem_budget()
    t_n, t_hw = _pick_tiles(N, C, O, HW, dtype_bytes, budget)
    total_bytes = dtype_bytes * N * (C + O) * HW
    t_n, t_hw = _ensure_megacore_split(N, HW, t_n, t_hw, total_bytes)

    # Re-check the chosen block against the vmem limit (extreme C+O): bump the
    # limit rather than failing to compile / degrading buffering silently.
    blk = 2 * t_n * (C + O) * t_hw * dtype_bytes
    if blk + (4 << 20) > vmem_limit:
        vmem_limit = blk + (4 << 20)

    grid = (pl.cdiv(N, t_n), pl.cdiv(HW, t_hw))

    cost = pl.CostEstimate(
        flops=2 * N * O * C * HW,
        transcendentals=0,
        bytes_accessed=dtype_bytes * (N * C * HW + N * O * HW + O * C + O),
    )

    out_flat = pl.pallas_call(
        _conv1x1_kernel,
        out_shape=jax.ShapeDtypeStruct((N, O, HW), x_nchw.dtype),
        grid_spec=pltpu.PrefetchScalarGridSpec(
            num_scalar_prefetch=0,
            grid=grid,
            in_specs=[
                pl.BlockSpec((t_n, C, t_hw), lambda i, j: (i, 0, j)),
                pl.BlockSpec((O, C), lambda i, j: (0, 0)),
                pl.BlockSpec((O, 1), lambda i, j: (0, 0)),
            ],
            out_specs=pl.BlockSpec((t_n, O, t_hw), lambda i, j: (i, 0, j)),
        ),
        compiler_params=pltpu.CompilerParams(
            dimension_semantics=("parallel", "parallel"),
            vmem_limit_bytes=int(vmem_limit),
        ),
        cost_estimate=cost,
    )(x_flat, w2d, b2d)

    return out_flat.reshape(N, O, H, W)


def feature_map_forward(x, weight, bias):
    """Reproduces FeatureMap.forward semantics (torch squeeze / np.newaxis glue)."""
    # NOTE: like the original torch module, this is fragile for N==1 or H==1/W==1
    # because squeeze drops ALL size-1 dims; semantics are mirrored on purpose.
    if x.ndim == 4:
        x = jnp.squeeze(x)          # torch.squeeze: drops ALL size-1 dims
        x = x[:, None, :, :]        # x[:, np.newaxis, :, :]
    if x.ndim == 5:
        x = jnp.squeeze(x)
    return conv1x1_pallas(x, weight, bias)


if __name__ == "__main__":
    key = jax.random.PRNGKey(0)
    k_x, k_w, k_b = jax.random.split(key, 3)

    # Conv2d(4, 8, kernel_size=1); input (2, 4, 16, 16) exercises both glue
    # branches of forward(): 4-D -> newaxis -> 5-D -> squeeze -> (2, 4, 16, 16).
    input_channels = 4
    output_channels = 8
    N, H, W = 2, 16, 16

    weight = jax.random.normal(
        k_w, (output_channels, input_channels, 1, 1), dtype=jnp.float32) * 0.1
    bias = jax.random.normal(k_b, (output_channels,), dtype=jnp.float32) * 0.1
    x = jax.random.normal(k_x, (N, input_channels, H, W), dtype=jnp.float32)

    out = feature_map_forward(x, weight, bias)
    out = jax.block_until_ready(out)

    # Reference: replicate the torch glue + 1x1 conv in plain JAX.
    x_eff = x
    if x_eff.ndim == 4:
        x_eff = jnp.squeeze(x_eff)
        x_eff = x_eff[:, None, :, :]
    if x_eff.ndim == 5:
        x_eff = jnp.squeeze(x_eff)
    ref = jnp.einsum(
        "oc,nchw->nohw",
        weight.reshape(output_channels, input_channels), x_eff,
    ) + bias.reshape(1, output_channels, 1, 1)

    assert out.shape == ref.shape, (out.shape, ref.shape)
    assert jnp.allclose(out, ref, atol=1e-5, rtol=1e-5)

    print("KERNEL_OK")
</pallas_src>

<mosaic_0001>
module attributes {stable_mosaic.version = 11 : i64} {
  func.func @_conv1x1_kernel(%arg0: i32, %arg1: i32, %arg2: memref<2x4x256xf32, #tpu.memory_space<vmem>>, %arg3: memref<8x4xf32, #tpu.memory_space<vmem>>, %arg4: memref<8x1xf32, #tpu.memory_space<vmem>>, %arg5: memref<2x8x256xf32, #tpu.memory_space<vmem>>) attributes {dimension_semantics = [#tpu.dimension_semantics<parallel>, #tpu.dimension_semantics<parallel>], iteration_bounds = array<i64: 1, 1>, scalar_prefetch = 0 : i64, scratch_operands = 0 : i64, tpu.core_type = #tpu.core_type<tc>, window_params = [{transform_indices = @transform_0, window_bounds = array<i64: 2, 4, 256>}, {pipeline_mode = #tpu.pipeline_mode<synchronous>, transform_indices = @transform_1, window_bounds = array<i64: 8, 4>}, {pipeline_mode = #tpu.pipeline_mode<synchronous>, transform_indices = @transform_2, window_bounds = array<i64: 8, 1>}, {transform_indices = @transform_3, window_bounds = array<i64: 2, 8, 256>}]} {
    %c0 = arith.constant 0 : index
    %c0_0 = arith.constant 0 : index
    %0 = vector.load %arg4[%c0, %c0_0] : memref<8x1xf32, #tpu.memory_space<vmem>>, vector<8x1xf32>
    %c0_1 = arith.constant 0 : index
    %c0_2 = arith.constant 0 : index
    %1 = vector.load %arg3[%c0_1, %c0_2] : memref<8x4xf32, #tpu.memory_space<vmem>>, vector<8x4xf32>
    %2 = vector.extract_strided_slice %1 {offsets = [0, 0], sizes = [8, 1], strides = [1, 1]} : vector<8x4xf32> to vector<8x1xf32>
    %3 = vector.shape_cast %2 : vector<8x1xf32> to vector<1x8x1xf32>
    %c0_3 = arith.constant 0 : index
    %c0_4 = arith.constant 0 : index
    %c0_5 = arith.constant 0 : index
    %4 = vector.load %arg2[%c0_3, %c0_4, %c0_5] : memref<2x4x256xf32, #tpu.memory_space<vmem>>, vector<2x1x256xf32>
    %5 = vector.broadcast %3 : vector<1x8x1xf32> to vector<2x8x256xf32>
    %6 = vector.broadcast %4 : vector<2x1x256xf32> to vector<2x8x256xf32>
    %7 = arith.mulf %5, %6 : vector<2x8x256xf32>
    %8 = vector.extract_strided_slice %1 {offsets = [0, 1], sizes = [8, 1], strides = [1, 1]} : vector<8x4xf32> to vector<8x1xf32>
    %9 = vector.shape_cast %8 : vector<8x1xf32> to vector<1x8x1xf32>
    %c0_6 = arith.constant 0 : index
    %c1 = arith.constant 1 : index
    %c0_7 = arith.constant 0 : index
    %10 = vector.load %arg2[%c0_6, %c1, %c0_7] : memref<2x4x256xf32, #tpu.memory_space<vmem>>, vector<2x1x256xf32>
    %11 = vector.broadcast %9 : vector<1x8x1xf32> to vector<2x8x256xf32>
    %12 = vector.broadcast %10 : vector<2x1x256xf32> to vector<2x8x256xf32>
    %13 = arith.mulf %11, %12 : vector<2x8x256xf32>
    %14 = arith.addf %7, %13 : vector<2x8x256xf32>
    %15 = vector.extract_strided_slice %1 {offsets = [0, 2], sizes = [8, 1], strides = [1, 1]} : vector<8x4xf32> to vector<8x1xf32>
    %16 = vector.shape_cast %15 : vector<8x1xf32> to vector<1x8x1xf32>
    %c0_8 = arith.constant 0 : index
    %c2 = arith.constant 2 : index
    %c0_9 = arith.constant 0 : index
    %17 = vector.load %arg2[%c0_8, %c2, %c0_9] : memref<2x4x256xf32, #tpu.memory_space<vmem>>, vector<2x1x256xf32>
    %18 = vector.broadcast %16 : vector<1x8x1xf32> to vector<2x8x256xf32>
    %19 = vector.broadcast %17 : vector<2x1x256xf32> to vector<2x8x256xf32>
    %20 = arith.mulf %18, %19 : vector<2x8x256xf32>
    %21 = arith.addf %14, %20 : vector<2x8x256xf32>
    %22 = vector.extract_strided_slice %1 {offsets = [0, 3], sizes = [8, 1], strides = [1, 1]} : vector<8x4xf32> to vector<8x1xf32>
    %23 = vector.shape_cast %22 : vector<8x1xf32> to vector<1x8x1xf32>
    %c0_10 = arith.constant 0 : index
    %c3 = arith.constant 3 : index
    %c0_11 = arith.constant 0 : index
    %24 = vector.load %arg2[%c0_10, %c3, %c0_11] : memref<2x4x256xf32, #tpu.memory_space<vmem>>, vector<2x1x256xf32>
    %25 = vector.broadcast %23 : vector<1x8x1xf32> to vector<2x8x256xf32>
    %26 = vector.broadcast %24 : vector<2x1x256xf32> to vector<2x8x256xf32>
    %27 = arith.mulf %25, %26 : vector<2x8x256xf32>
    %28 = arith.addf %21, %27 : vector<2x8x256xf32>
    %29 = vector.shape_cast %0 : vector<8x1xf32> to vector<1x8x1xf32>
    %30 = vector.broadcast %29 : vector<1x8x1xf32> to vector<2x8x256xf32>
    %31 = arith.addf %28, %30 : vector<2x8x256xf32>
    %c0_12 = arith.constant 0 : index
    %c0_13 = arith.constant 0 : index
    %c0_14 = arith.constant 0 : index
    %32 = vector.load %arg5[%c0_12, %c0_13, %c0_14] : memref<2x8x256xf32, #tpu.memory_space<vmem>>, vector<2x8x256xf32>
    tpu.vector_store %arg5[%c0_12, %c0_13, %c0_14], %31 {strides = array<i32>} : memref<2x8x256xf32, #tpu.memory_space<vmem>>, vector<2x8x256xf32>,
    return
  }
  func.func @transform_0(%arg0: i32, %arg1: i32) -> (i32, i32, i32) {
    %c0_i32 = arith.constant 0 : i32
    %c0_i32_0 = arith.constant 0 : i32
    return %arg0, %c0_i32, %arg1 : i32, i32, i32
  }
  func.func @transform_1(%arg0: i32, %arg1: i32) -> (i32, i32) {
    %c0_i32 = arith.constant 0 : i32
    %c0_i32_0 = arith.constant 0 : i32
    %c0_i32_1 = arith.constant 0 : i32
    return %c0_i32, %c0_i32_0 : i32, i32
  }
  func.func @transform_2(%arg0: i32, %arg1: i32) -> (i32, i32) {
    %c0_i32 = arith.constant 0 : i32
    %c0_i32_0 = arith.constant 0 : i32
    %c0_i32_1 = arith.constant 0 : i32
    return %c0_i32, %c0_i32_0 : i32, i32
  }
  func.func @transform_3(%arg0: i32, %arg1: i32) -> (i32, i32, i32) {
    %c0_i32 = arith.constant 0 : i32
    %c0_i32_0 = arith.constant 0 : i32
    return %arg0, %c0_i32, %arg1 : i32, i32, i32
  }
}

</mosaic_0001>

<bundles_post_ra>
// kernel: tpu_custom_call.1
= control target key start
LH: loop header
LB: loop body
LE: loop exit
PB: predicated region body
PF: predicated region fallthrough
CT: control target
= control target key end

     0   :  { %v238_v1 = vmov 0   ;;  %v239_v2 = vmov 2   ;;  %s307_s0 = inlined_call_operand.vmem [shape: f32[2,4,256], index: 0, kind: input, shape index: {}]   ;;  %s308_s1 = inlined_call_operand.vmem [shape: f32[8,4], index: 1, kind: input, shape index: {}]   ;;  %s309_s2 = inlined_call_operand.vmem [shape: f32[8,1], index: 2, kind: input, shape index: {}]   ;;  %s310_s3 = inlined_call_operand.hbm [shape: f32[2,8,256], index: 3, kind: output, shape index: {}]  }
   0x1   :  { %v16_v0 = vld [vmem:[%s308_s1] sm:$0xff]  ;;  %208 = vset.pattern.permute.xlu0 %v238_v1  ;;  %210 = vset.pattern.permute.xlu1 %v239_v2 }
   0x2   :  { %22 = vperm.xlu0 %208, %v16_v0   ;;  %94 = vperm.xlu1 %210, %v16_v0  }
   0x3   :  { %8 = vsyncpa [#allocation3], 0  ;;  %v240_v3 = vmov 1   ;;  %v241_v4 = vmov 3   ;;  %v15_v5 = vld [vmem:[%s309_s2] sm:$0xff]  ;;  %v27_v6 = vlaneseq }
   0x4   :  { %v17_v10 = vld [vmem:[%s307_s0] ss:$4 sm:$0x3]  ;;  %v194_v11 = vld [vmem:[%s307_s0 + $0x8] ss:$4 sm:$0x3] }
   0x5   :  { %v28_v7 = vshrl.u32 %v27_v6, 7  ;;  %v197_v12 = vld [vmem:[%s307_s0 + $0x2] ss:$4 sm:$0x3] }
   0x6   :  { %209 = vset.pattern.permute.xlu0 %v240_v3  ;;  %211 = vset.pattern.permute.xlu1 %v241_v4  ;;  %v198_v13 = vld [vmem:[%s307_s0 + $0xa] ss:$4 sm:$0x3]  ;;  %v195_v14 = vld [vmem:[%s307_s0 + $0x1] ss:$4 sm:$0x3] }
   0x7   :  { %56 = vperm.xlu0 %209, %v16_v0   ;;  %132 = vperm.xlu1 %211, %v16_v0   ;;  %v29_v8 = vsub.s32 0, %v28_v7  ;;  %v33_v9 = vsub.s32 1, %v28_v7  ;;  %v196_v15 = vld [vmem:[%s307_s0 + $0x9] ss:$4 sm:$0x3] }
   0x8   :  { %v199_v22 = vld [vmem:[%s307_s0 + $0x3] ss:$4 sm:$0x3]  ;;  %v200_v23 = vld [vmem:[%s307_s0 + $0xb] ss:$4 sm:$0x3] }
   0x9   :  { %v30_v16 = vrot.slane %v17_v10, %v29_v8  ;;  %v34_v17 = vrot.slane %v17_v10, %v33_v9  ;;  %v38_v18 = vrot.slane %v194_v11, %v29_v8  ;;  %v42_v19 = vrot.slane %v194_v11, %v33_v9  ;;  %s242_s0 = smov [#allocation2]  }
   0xa   :  { %v102_v24 = vrot.slane %v197_v12, %v29_v8  ;;  %v106_v25 = vrot.slane %v197_v12, %v33_v9  ;;  %v110_v26 = vrot.slane %v198_v13, %v29_v8  ;;  %v114_v27 = vrot.slane %v198_v13, %v33_v9  ;;  %s183_s30 = sshll.u32 %s242_s0, 4  ;;  %s184_s30 = int_to_ptr.vmem [resolvable:$true] %s183_s30 }
   0xb   :  { %212 = vset.pattern.permute.xlu1 %v238_v1  ;;  %213 = vset.pattern.permute.xlu0 %v238_v1  ;;  %v64_v28 = vrot.slane %v195_v14, %v29_v8  ;;  %v68_v29 = vrot.slane %v195_v14, %v33_v9  ;;  %v72_v30 = vrot.slane %v196_v15, %v29_v8  ;;  %s214_s4 = scalar_lea.vmem %s184_s30, 512  ;;  %p219_p1 = scmp.lt.s32.totalorder %s184_s30, %s184_s30 }
   0xc   :  { %167 = vperm.xlu1 %212, %v15_v5   ;;  %v76_v31 = vrot.slane %v196_v15, %v33_v9  ;;  %v140_v32 = vrot.slane %v199_v22, %v29_v8  ;;  %v144_v33 = vrot.slane %v199_v22, %v33_v9  ;;  %v148_v34 = vrot.slane %v200_v23, %v29_v8  ;;  %p215_p0 = scmp.ne.s32.totalorder %s184_s30, %s214_s4  ;;  %p220_p2 = scmp.lt.s32.totalorder %s214_s4, %s214_s4 }
   0xd   :  { %v152_v35 = vrot.slane %v200_v23, %v33_v9 }
   0xe   :  { %p221_p3 = por %p220_p2, %p219_p1 }
  0x10   :  { %p222_p4 = pnand %p221_p3, %p215_p0 }
  0x81   :  { %v23_v20 = vpop.permute.xlu0 %22  ;;  %v95_v21 = vpop.permute.xlu1 %94 }
  0x82   :  { %v47_v36 = vmul.f32 %v30_v16, %v23_v20  ;;  %v48_v37 = vmul.f32 %v34_v17, %v23_v20  ;;  %v49_v38 = vmul.f32 %v38_v18, %v23_v20  ;;  %v50_v39 = vmul.f32 %v42_v19, %v23_v20 }
  0x83   :  { %v119_v40 = vmul.f32 %v102_v24, %v95_v21  ;;  %v120_v41 = vmul.f32 %v106_v25, %v95_v21  ;;  %v121_v42 = vmul.f32 %v110_v26, %v95_v21  ;;  %v122_v43 = vmul.f32 %v114_v27, %v95_v21 }
  0x86   :  { %v57_v44 = vpop.permute.xlu0 %56  ;;  %v133_v45 = vpop.permute.xlu1 %132 }
  0x87   :  { %v81_v46 = vmul.f32 %v64_v28, %v57_v44  ;;  %v82_v47 = vmul.f32 %v68_v29, %v57_v44  ;;  %v83_v48 = vmul.f32 %v72_v30, %v57_v44  ;;  %v84_v49 = vmul.f32 %v76_v31, %v57_v44 }
  0x88   :  { %v157_v50 = vmul.f32 %v140_v32, %v133_v45  ;;  %v158_v51 = vmul.f32 %v144_v33, %v133_v45  ;;  %v159_v52 = vmul.f32 %v148_v34, %v133_v45  ;;  %v160_v53 = vmul.f32 %v152_v35, %v133_v45 }
  0x89   :  { %v85_v54 = vadd.f32 %v81_v46, %v47_v36  ;;  %v86_v55 = vadd.f32 %v82_v47, %v48_v37  ;;  %v87_v56 = vadd.f32 %v83_v48, %v49_v38  ;;  %v88_v57 = vadd.f32 %v84_v49, %v50_v39 }
  0x8b   :  { %v123_v58 = vadd.f32 %v119_v40, %v85_v54  ;;  %v124_v59 = vadd.f32 %v120_v41, %v86_v55  ;;  %v125_v60 = vadd.f32 %v121_v42, %v87_v56  ;;  %v126_v61 = vadd.f32 %v122_v43, %v88_v57  ;;  %v168_v62 = vpop.permute.xlu1 %167 }
  0x8d   :  { %v161_v63 = vadd.f32 %v157_v50, %v123_v58  ;;  %v162_v0 = vadd.f32 %v158_v51, %v124_v59  ;;  %v163_v1 = vadd.f32 %v159_v52, %v125_v60  ;;  %v164_v2 = vadd.f32 %v160_v53, %v126_v61 }
  0x8f   :  { %v170_v3 = vadd.f32 %v168_v62, %v161_v63  ;;  %v171_v4 = vadd.f32 %v168_v62, %v162_v0  ;;  %v172_v5 = vadd.f32 %v168_v62, %v163_v1  ;;  %v173_v6 = vadd.f32 %v168_v62, %v164_v2 }
  0x91   :  { %174 = vst [vmem:[#allocation2] sm:$0xff] %v170_v3  ;;  %175 = vst [vmem:[#allocation2 + $0x8] sm:$0xff] %v171_v4 }
  0x92   :  { %176 = vst [vmem:[#allocation2 + $0x10] sm:$0xff] %v172_v5  ;;  %177 = vst [vmem:[#allocation2 + $0x18] sm:$0xff] %v173_v6 }
  0x93   :  { %225 = shalt.err (!%p222_p4)
}
  0x94   :  { %s226_s7 = scalar_lea.hbm %s310_s3, 512 }
  0x95   :  { %p227_p5 = scmp.ne.s32.totalorder %s310_s3, %s226_s7  ;;  %p230_p6 = scmp.lt.u32.totalorder %s226_s7, %s310_s3 }
  0x97   :  { %p232_p7 = pnand %p230_p6, %p227_p5 }
  0x99   :  { %235 = shalt.err (!%p232_p7)
}
  0x9a   :  { %s243_s12 = smov 256   ;;  %s244_s13 = smov 16  }
  0x9b   :  { %189 = dma.vmem_to_hbm [thread:$0]  %s184_s30, 512, %s310_s3, [#allocation3], %s243_s12, %s243_s12, %s244_s13  }
  0x9c   :  { %236 = dma.done.wait [#allocation3], 512  }
  0x9d   :  { %237 = vsyncadd [#allocation3], 4294966784 }
  0x9e   :  { %193 = vsyncpa [#allocation3], 1 }

</bundles_post_ra>
